<compile_context>
chip_gen: v7x
topology: tpu7x:2x2x1
jax: 0.10.0
libtpu: 0.0.40
codegen_flags: <defaults>
</compile_context>

<pallas_src>
import jax
import jax.numpy as jnp
from jax.experimental import pallas as pl
from jax.experimental.pallas import tpu as pltpu


def linear_kernel(x_ref, w_ref, o_ref):
    """y[b, n] = sum_k x[b, k] * w[n, k]   (nn.Linear, bias=False).

    x_ref: (B, K)  VMEM  (full block)
    w_ref: (N, K)  SMEM  (tiny weight, read as scalars)
    o_ref: (B, N)  VMEM
    """
    n_out, n_in = w_ref.shape  # static (2, 2) -> loops fully unroll
    for n in range(n_out):
        # (B, 1) vector * SMEM scalar broadcast -> pure VPU (vmul + vadd).
        col = x_ref[:, 0:1] * w_ref[n, 0]
        for k in range(1, n_in):
            col = col + x_ref[:, k:k + 1] * w_ref[n, k]
        # NOTE: out_features=2 -> 1-lane-wide masked stores; irrelevant at this
        # size.  If this layer is ever scaled up, restructure for a lane-dense
        # output (B on the lane axis) and tile the batch with a "parallel" grid.
        o_ref[:, n:n + 1] = col.astype(o_ref.dtype)


def mapping_net_forward(x, weight):
    """y = x @ weight.T  (nn.Linear(2, 2, bias=False)).

    `weight` is kept in PyTorch (out_features, in_features) layout; the
    contraction over in_features is expressed directly inside the kernel, so
    no transpose is emitted outside the pallas_call.
    """
    B, in_f = x.shape
    out_f, in_f_w = weight.shape
    assert in_f == in_f_w, "weight / input feature mismatch"

    return pl.pallas_call(
        linear_kernel,
        out_shape=jax.ShapeDtypeStruct((B, out_f), x.dtype),
        in_specs=[
            pl.BlockSpec(memory_space=pltpu.MemorySpace.VMEM),  # x: whole array
            pl.BlockSpec(memory_space=pltpu.MemorySpace.SMEM),  # weight scalars
        ],
        out_specs=pl.BlockSpec(memory_space=pltpu.MemorySpace.VMEM),
    )(x, weight)


if __name__ == "__main__":
    key = jax.random.PRNGKey(0)
    kx, kw = jax.random.split(key)

    # Deterministic parameters matching nn.Linear(2, 2, bias=False):
    # weight shape (out_features, in_features) = (2, 2), U(-1/sqrt(2), 1/sqrt(2)).
    bound = 1.0 / jnp.sqrt(2.0)
    weight = jax.random.uniform(
        kw, (2, 2), dtype=jnp.float32, minval=-bound, maxval=bound
    )

    # Input: batch of 8 vectors with 2 features each.
    x = jax.random.normal(kx, (8, 2), dtype=jnp.float32)

    y = mapping_net_forward(x, weight)
    y = jax.block_until_ready(y)

    # Reference check in plain JAX.
    y_ref = x @ weight.T
    assert y.shape == (8, 2)
    assert jnp.allclose(y, y_ref, atol=1e-5, rtol=1e-5)

    print("KERNEL_OK")
</pallas_src>

<mosaic_0001>
module attributes {stable_mosaic.version = 11 : i64} {
  func.func @linear_kernel(%arg0: memref<8x2xf32, #tpu.memory_space<vmem>>, %arg1: memref<2x2xf32, #tpu.memory_space<smem>>, %arg2: memref<8x2xf32, #tpu.memory_space<vmem>>) attributes {dimension_semantics = [], scalar_prefetch = 0 : i64, scratch_operands = 0 : i64, tpu.core_type = #tpu.core_type<tc>} {
    %c0 = arith.constant 0 : index
    %c0_0 = arith.constant 0 : index
    %0 = vector.load %arg0[%c0, %c0_0] : memref<8x2xf32, #tpu.memory_space<vmem>>, vector<8x1xf32>
    %c0_1 = arith.constant 0 : index
    %c0_2 = arith.constant 0 : index
    %1 = memref.load %arg1[%c0_1, %c0_2] : memref<2x2xf32, #tpu.memory_space<smem>>
    %2 = vector.broadcast %1 : f32 to vector<8x1xf32>
    %3 = arith.mulf %0, %2 : vector<8x1xf32>
    %c0_3 = arith.constant 0 : index
    %c1 = arith.constant 1 : index
    %4 = vector.load %arg0[%c0_3, %c1] : memref<8x2xf32, #tpu.memory_space<vmem>>, vector<8x1xf32>
    %c0_4 = arith.constant 0 : index
    %c1_5 = arith.constant 1 : index
    %5 = memref.load %arg1[%c0_4, %c1_5] : memref<2x2xf32, #tpu.memory_space<smem>>
    %6 = vector.broadcast %5 : f32 to vector<8x1xf32>
    %7 = arith.mulf %4, %6 : vector<8x1xf32>
    %8 = arith.addf %3, %7 : vector<8x1xf32>
    %c0_6 = arith.constant 0 : index
    %c0_7 = arith.constant 0 : index
    %9 = vector.load %arg2[%c0_6, %c0_7] : memref<8x2xf32, #tpu.memory_space<vmem>>, vector<8x1xf32>
    tpu.vector_store %arg2[%c0_6, %c0_7], %8 {strides = array<i32>} : memref<8x2xf32, #tpu.memory_space<vmem>>, vector<8x1xf32>,
    %c0_8 = arith.constant 0 : index
    %c0_9 = arith.constant 0 : index
    %10 = vector.load %arg0[%c0_8, %c0_9] : memref<8x2xf32, #tpu.memory_space<vmem>>, vector<8x1xf32>
    %c1_10 = arith.constant 1 : index
    %c0_11 = arith.constant 0 : index
    %11 = memref.load %arg1[%c1_10, %c0_11] : memref<2x2xf32, #tpu.memory_space<smem>>
    %12 = vector.broadcast %11 : f32 to vector<8x1xf32>
    %13 = arith.mulf %10, %12 : vector<8x1xf32>
    %c0_12 = arith.constant 0 : index
    %c1_13 = arith.constant 1 : index
    %14 = vector.load %arg0[%c0_12, %c1_13] : memref<8x2xf32, #tpu.memory_space<vmem>>, vector<8x1xf32>
    %c1_14 = arith.constant 1 : index
    %c1_15 = arith.constant 1 : index
    %15 = memref.load %arg1[%c1_14, %c1_15] : memref<2x2xf32, #tpu.memory_space<smem>>
    %16 = vector.broadcast %15 : f32 to vector<8x1xf32>
    %17 = arith.mulf %14, %16 : vector<8x1xf32>
    %18 = arith.addf %13, %17 : vector<8x1xf32>
    %c0_16 = arith.constant 0 : index
    %c1_17 = arith.constant 1 : index
    %19 = vector.load %arg2[%c0_16, %c1_17] : memref<8x2xf32, #tpu.memory_space<vmem>>, vector<8x1xf32>
    tpu.vector_store %arg2[%c0_16, %c1_17], %18 {strides = array<i32>} : memref<8x2xf32, #tpu.memory_space<vmem>>, vector<8x1xf32>,
    return
  }
}

</mosaic_0001>

<bundles_post_ra>
// kernel: tpu_custom_call.1
= control target key start
LH: loop header
LB: loop body
LE: loop exit
PB: predicated region body
PF: predicated region fallthrough
CT: control target
= control target key end

     0   :  { %7 = vsyncpa [#allocation3], 0  ;;  %s111_s0 = inlined_call_operand.vmem [shape: f32[8,2], index: 0, kind: input, shape index: {}]   ;;  %s112_s1 = inlined_call_operand.vmem [shape: f32[2,2], index: 1, kind: input, shape index: {}]   ;;  %s113_s2 = inlined_call_operand.vmem [shape: f32[8,2], index: 2, kind: output, shape index: {}]  }
   0x1   :  { %s16_s11 = sshll.u32 %s112_s1, 4  ;;  %s17_s11 = int_to_ptr.vmem [resolvable:$true] %s16_s11 }
   0x2   :  { %s67_s12 = scalar_lea.vmem %s17_s11, 32  ;;  %p72_p1 = scmp.lt.s32.totalorder %s17_s11, %s17_s11 }
   0x3   :  { %p68_p0 = scmp.ne.s32.totalorder %s17_s11, %s67_s12  ;;  %p73_p2 = scmp.lt.s32.totalorder %s67_s12, %s67_s12 }
   0x5   :  { %p74_p3 = por %p73_p2, %p72_p1 }
   0x7   :  { %p75_p4 = pnand %p74_p3, %p68_p0 }
   0x9   :  { %78 = shalt.err (!%p75_p4)
}
   0xa   :  { %s81_s13 = smov [#allocation2]  }
   0xb   :  { %19 = dma.vmem_to_smem %s17_s11, 32, %s81_s13, [#allocation3]  }
   0xc   :  { %79 = dma.done.wait [#allocation3], 32  }
   0xd   :  { %80 = vsyncadd [#allocation3], 4294967264 }
   0xe   :  { %23 = sfence }
   0xf   :  { %s63_s14 = sld [smem:[#allocation2 + $0x81]]  ;;  %v38_v0 = vld [vmem:[%s111_s0] sm:$0xff]  ;;  %s82_s1 = smov 127   ;;  %vm36_vm0 = vcmask 7168   ;;  %vm54_vm1 = vcmask 15368  }
  0x10   :  { %s61_s15 = sld [smem:[#allocation2 + $0x1]]  ;;  %s62_s18 = sld [smem:[#allocation2 + $0x80]] }
  0x11   :  { %s25_s19 = sld [smem:[#allocation2]]  ;;  %s83_s20 = smov 1  }
  0x15   :  { %v43_v1 = vstv %s63_s14 }
  0x16   :  { %v44_v2 = vmul.f32 %v43_v1, %v38_v0  ;;  %v29_v3 = vstv %s61_s15  ;;  %v40_v5 = vstv %s62_s18 }
  0x17   :  { %v30_v4 = vmul.f32 %v38_v0, %v29_v3  ;;  %v41_v6 = vmul.f32 %v40_v5, %v38_v0  ;;  %v26_v7 = vstv %s25_s19 }
  0x18   :  { %46 = vrot.lane.b32.xlu0 %v44_v2, %s82_s1  ;;  %v27_v10 = vmul.f32 %v38_v0, %v26_v7 }
  0x1c   :  { %32 = vrot.lane.b32.xlu0 %v30_v4, %s82_s1 }
  0x8a   :  { %v47_v8 = vpop.permute.xlu0 %46 }
  0x8b   :  { %v49_v9 = vadd.f32 %v47_v8, %v41_v6 }
  0x8d   :  { %51 = vrot.lane.b32.xlu1 %v49_v9, %s83_s20 }
  0x8e   :  { %v33_v11 = vpop.permute.xlu0 %32 }
  0x8f   :  { %v35_v12 = vadd.f32 %v33_v11, %v27_v10 }
  0x91   :  { %37 = vst.msk [vmem:[%s113_s2] sm:$0xff] %vm36_vm0, %v35_v12 }
  0xff   :  { %v52_v13 = vpop.permute.xlu1 %51 }
 0x100   :  { %55 = vst.msk [vmem:[%s113_s2] sm:$0xff] %vm54_vm1, %v52_v13 }
 0x101   :  { %60 = vsyncpa [#allocation3], 1 }

</bundles_post_ra>
